<compile_context>
chip_gen: v7x
topology: tpu7x:2x2x1
jax: 0.10.0
libtpu: 0.0.40
codegen_flags: <defaults>
</compile_context>

<pallas_src>
import jax
import jax.numpy as jnp
from jax.experimental import pallas as pl
from jax.experimental.pallas import tpu as pltpu


_COLOR_ROWS = 8   # color LHS padded to a full f32 sublane tile (rows 3..7 zero)


# ---------------------------------------------------------------------------
# Kernel 1: one-shot per-vertex shading (Lambertian + tangent "sheen" proxy).
# Layout: lane axis = vertices, sublane axis = xyz -> fully lane-packed VPU /
# EUP work; xyz reductions are explicit row adds (no cross-lane XLU reduce).
# Output is (8, V) f32: rows 0..2 = RGB, rows 3..7 = 0 (sublane-tile padding
# so the splat LHS load / output store need no masked sub-tile accesses).
# ---------------------------------------------------------------------------
def _shade_kernel(light_ref, pos_ref, nrm_ref, tan_ref, color_ref):
    light = light_ref[...]          # (3, 1) f32, assumed pre-normalized
    pos = pos_ref[...]              # (3, V) f32
    nrm = nrm_ref[...]              # (3, V) f32
    tan = tan_ref[...]              # (3, V) f32

    n2 = nrm * nrm
    inv_len = jax.lax.rsqrt(n2[0:1] + n2[1:2] + n2[2:3] + 1e-8)        # (1, V)
    nl = nrm * light                                                    # (3, V)
    ndotl = jnp.maximum((nl[0:1] + nl[1:2] + nl[2:3]) * inv_len, 0.0)   # (1, V)
    albedo = 0.5 + 0.5 * jnp.tanh(pos)                                  # (3, V)
    tl = tan * light
    sheen = 0.1 * jnp.abs(tl[0:1] + tl[1:2] + tl[2:3])                  # (1, V)
    rgb = (albedo * ndotl + sheen).astype(color_ref.dtype)              # (3, V)

    color_ref[...] = jnp.zeros_like(color_ref)   # zero padding rows 3..7
    color_ref[0:3, :] = rgb


# ---------------------------------------------------------------------------
# Kernel 2: rasterization splat.  Streams native-layout (TP, V) weight tiles
# from HBM and contracts against the resident (8, V) color block on the MXU:
#   color (8, V) . W_tile (TP, V)^T -> (8, TP), f32 accumulation.
# ---------------------------------------------------------------------------
def _splat_kernel(color_ref, w_ref, out_ref):
    color = color_ref[...].astype(w_ref.dtype)          # tiny in-VMEM cast
    out_ref[...] = jax.lax.dot_general(
        color, w_ref[...],
        dimension_numbers=(((1,), (1,)), ((), ())),      # contract on V, V
        preferred_element_type=jnp.float32)


def _vmem_budget():
    """Generation-aware (capacity, tile-budget) in bytes.

    v7x has 64 MiB physical VMEM per TC vs 128 MiB on v5e/v6e; keep the
    double-buffered tiles to ~half of physical (capped at 56 MiB)."""
    cap = 64 << 20                       # conservative (v7x-sized) fallback
    try:
        cap = int(pltpu.get_tpu_info().vmem_capacity_bytes)
    except Exception:
        pass
    return cap, min(cap // 2, 56 << 20)


def _pick_pixel_tile(num_pixels, num_vertices, weight_bytes, budget_bytes,
                     out_rows=_COLOR_ROWS):
    """Pixel-tile size (multiple of 128 lanes) for the streaming splat.

    Budget-limited maximum tile (bigger tiles -> closer to HBM roofline,
    fewer per-step overheads), but keep >= 4 grid steps (even when cheap)
    whenever the image is large enough so the v7x megacore split of the
    "parallel" pixel axis stays balanced."""
    lane_tiles = pl.cdiv(num_pixels, 128)
    fixed = 2 * out_rows * num_vertices * 4                       # color dbl-buf
    per_lane_tile = (2 * num_vertices * weight_bytes + 2 * out_rows * 4) * 128
    budget_lanes = max(1, (budget_bytes - fixed) // per_lane_tile)

    if lane_tiles <= 3:
        # Tiny image: a single tile (or as much as the budget allows).
        return min(lane_tiles, budget_lanes) * 128

    tile_lanes = min(budget_lanes, max(1, lane_tiles // 4))
    steps = pl.cdiv(lane_tiles, tile_lanes)
    if steps % 2 and tile_lanes > 1:
        # Nudge toward an even step count (stays within budget: ceil is
        # non-increasing in the divisor).  Best-effort heuristic only.
        tile_lanes = pl.cdiv(lane_tiles, steps + 1)
    return tile_lanes * 128


def diff_render_forward(mesh_positions, mesh_normals, mesh_tangents,
                        raster_weights, light_dir, img_hw):
    """Pallas-backed stand-in for DiffRenderModule.forward.

    mesh_positions / mesh_normals / mesh_tangents : (V, 3) float32
    raster_weights : (H*W, V) float32 or bfloat16, native (pixel, vertex)
                     layout -- streamed as-is, no wrapper transpose/cast/pad.
    light_dir      : (1, 3) float32, must be pre-normalized (same contract as
                     the pure-JAX reference).
    img_hw         : (H, W)
    returns        : (H, W, 3) float32 rendered image
    """
    H, W = img_hw
    P = H * W
    V = mesh_positions.shape[0]
    ROWS = _COLOR_ROWS

    # Lane-dense layouts for the O(V) shading inputs (tiny transposes).
    pos_t = mesh_positions.T.astype(jnp.float32)               # (3, V)
    nrm_t = mesh_normals.T.astype(jnp.float32)                 # (3, V)
    tan_t = mesh_tangents.T.astype(jnp.float32)                # (3, V)
    light_t = light_dir.reshape(1, 3).T.astype(jnp.float32)    # (3, 1)

    # --- per-vertex shading: one-shot tiny kernel, O(V) -------------------
    color = pl.pallas_call(
        _shade_kernel,
        out_shape=jax.ShapeDtypeStruct((ROWS, V), jnp.float32),
        grid=(1,),
        in_specs=[
            pl.BlockSpec((3, 1), lambda i: (0, 0)),
            pl.BlockSpec((3, V), lambda i: (0, 0)),
            pl.BlockSpec((3, V), lambda i: (0, 0)),
            pl.BlockSpec((3, V), lambda i: (0, 0)),
        ],
        out_specs=pl.BlockSpec((ROWS, V), lambda i: (0, 0)),
    )(light_t, pos_t, nrm_t, tan_t)

    # --- rasterization splat: HBM-bandwidth-bound streaming matmul --------
    wbytes = jnp.dtype(raster_weights.dtype).itemsize
    cap, budget = _vmem_budget()
    TP = _pick_pixel_tile(P, V, wbytes, budget, ROWS)
    grid = (pl.cdiv(P, TP),)

    tiles_bytes = 2 * TP * V * wbytes + 2 * ROWS * TP * 4 + 2 * ROWS * V * 4
    vmem_limit = max(32 << 20, min(cap - (8 << 20), tiles_bytes + (16 << 20)))

    cost = pl.CostEstimate(
        flops=2 * ROWS * V * P,
        transcendentals=0,
        bytes_accessed=P * V * wbytes + ROWS * P * 4 + ROWS * V * 4,
    )

    img_t = pl.pallas_call(
        _splat_kernel,
        out_shape=jax.ShapeDtypeStruct((ROWS, P), jnp.float32),
        grid_spec=pltpu.PrefetchScalarGridSpec(
            num_scalar_prefetch=0,
            grid=grid,
            in_specs=[
                pl.BlockSpec((ROWS, V), lambda i: (0, 0)),   # colors (resident)
                pl.BlockSpec((TP, V), lambda i: (i, 0)),     # streamed weights
            ],
            out_specs=pl.BlockSpec((ROWS, TP), lambda i: (0, i)),
        ),
        compiler_params=pltpu.CompilerParams(
            dimension_semantics=("parallel",),
            vmem_limit_bytes=int(vmem_limit),
        ),
        cost_estimate=cost,
    )(color, raster_weights)

    # (8, P) -> keep RGB rows -> (P, 3) -> (H, W, 3), channels-last.
    return img_t[:3, :].T.reshape(H, W, 3)


def _reference(mesh_positions, mesh_normals, mesh_tangents,
               raster_weights, light_dir, img_hw):
    """Pure-JAX f32 reference for correctness checking."""
    H, W = img_hw
    n_hat = mesh_normals * jax.lax.rsqrt(
        jnp.sum(mesh_normals * mesh_normals, axis=-1, keepdims=True) + 1e-8)
    ndotl = jnp.maximum(jnp.sum(n_hat * light_dir, axis=-1, keepdims=True), 0.0)
    albedo = 0.5 + 0.5 * jnp.tanh(mesh_positions)
    sheen = 0.1 * jnp.abs(jnp.sum(mesh_tangents * light_dir, axis=-1, keepdims=True))
    color = albedo * ndotl + sheen
    return (raster_weights @ color).reshape(H, W, 3)


if __name__ == "__main__":
    key = jax.random.PRNGKey(0)
    k_pos, k_nrm, k_tan, k_w = jax.random.split(key, 4)

    V = 256            # number of mesh vertices
    H = W = 32         # rendered image resolution
    P = H * W

    mesh_positions = jax.random.normal(k_pos, (V, 3), dtype=jnp.float32)
    mesh_normals = jax.random.normal(k_nrm, (V, 3), dtype=jnp.float32)
    mesh_tangents = jax.random.normal(k_tan, (V, 3), dtype=jnp.float32)

    # Deterministic "scene" parameters (stand-ins for testbed/passes/params).
    light_dir = jnp.array([[0.3, 0.8, 0.52]], dtype=jnp.float32)
    light_dir = light_dir / jnp.linalg.norm(light_dir)          # pre-normalized

    # Splat matrix in its native (P, V) layout.  The bf16 cast is fused into
    # the producer (single HBM pass) -- the kernel streams whatever dtype it
    # is handed (f32 also works, at 2x the weight-read bytes).
    raster_logits = jax.random.normal(k_w, (P, V), dtype=jnp.float32)
    raster_weights = jax.nn.softmax(raster_logits, axis=-1).astype(jnp.bfloat16)

    img = diff_render_forward(mesh_positions, mesh_normals, mesh_tangents,
                              raster_weights, light_dir, (H, W))
    img = jax.block_until_ready(img)

    ref = _reference(mesh_positions, mesh_normals, mesh_tangents,
                     raster_weights.astype(jnp.float32), light_dir, (H, W))
    assert img.shape == (H, W, 3) and img.dtype == jnp.float32
    # Weights are streamed in bf16 and the color LHS is cast to bf16 on the
    # MXU (f32 accumulation), so compare with a bf16-level bound.
    assert jnp.allclose(img, ref, atol=2e-2, rtol=2e-2), (
        float(jnp.max(jnp.abs(img - ref))))

    print("KERNEL_OK")
</pallas_src>

<mosaic_0001>
module attributes {stable_mosaic.version = 11 : i64} {
  func.func @_shade_kernel(%arg0: i32, %arg1: memref<3x1xf32, #tpu.memory_space<vmem>>, %arg2: memref<3x256xf32, #tpu.memory_space<vmem>>, %arg3: memref<3x256xf32, #tpu.memory_space<vmem>>, %arg4: memref<3x256xf32, #tpu.memory_space<vmem>>, %arg5: memref<8x256xf32, #tpu.memory_space<vmem>>) attributes {dimension_semantics = [#tpu.dimension_semantics<arbitrary>], iteration_bounds = array<i64: 1>, scalar_prefetch = 0 : i64, scratch_operands = 0 : i64, tpu.core_type = #tpu.core_type<tc>, window_params = [{pipeline_mode = #tpu.pipeline_mode<synchronous>, transform_indices = @transform_0, window_bounds = array<i64: 3, 1>}, {pipeline_mode = #tpu.pipeline_mode<synchronous>, transform_indices = @transform_1, window_bounds = array<i64: 3, 256>}, {pipeline_mode = #tpu.pipeline_mode<synchronous>, transform_indices = @transform_2, window_bounds = array<i64: 3, 256>}, {pipeline_mode = #tpu.pipeline_mode<synchronous>, transform_indices = @transform_3, window_bounds = array<i64: 3, 256>}, {pipeline_mode = #tpu.pipeline_mode<synchronous>, transform_indices = @transform_4, window_bounds = array<i64: 8, 256>}]} {
    %c0 = arith.constant 0 : index
    %c0_0 = arith.constant 0 : index
    %0 = vector.load %arg1[%c0, %c0_0] : memref<3x1xf32, #tpu.memory_space<vmem>>, vector<3x1xf32>
    %c0_1 = arith.constant 0 : index
    %c0_2 = arith.constant 0 : index
    %1 = vector.load %arg2[%c0_1, %c0_2] : memref<3x256xf32, #tpu.memory_space<vmem>>, vector<3x256xf32>
    %c0_3 = arith.constant 0 : index
    %c0_4 = arith.constant 0 : index
    %2 = vector.load %arg3[%c0_3, %c0_4] : memref<3x256xf32, #tpu.memory_space<vmem>>, vector<3x256xf32>
    %c0_5 = arith.constant 0 : index
    %c0_6 = arith.constant 0 : index
    %3 = vector.load %arg4[%c0_5, %c0_6] : memref<3x256xf32, #tpu.memory_space<vmem>>, vector<3x256xf32>
    %4 = arith.mulf %2, %2 : vector<3x256xf32>
    %5 = vector.extract_strided_slice %4 {offsets = [0, 0], sizes = [1, 256], strides = [1, 1]} : vector<3x256xf32> to vector<1x256xf32>
    %6 = vector.extract_strided_slice %4 {offsets = [1, 0], sizes = [1, 256], strides = [1, 1]} : vector<3x256xf32> to vector<1x256xf32>
    %7 = arith.addf %5, %6 : vector<1x256xf32>
    %8 = vector.extract_strided_slice %4 {offsets = [2, 0], sizes = [1, 256], strides = [1, 1]} : vector<3x256xf32> to vector<1x256xf32>
    %9 = arith.addf %7, %8 : vector<1x256xf32>
    %cst = arith.constant 9.99999993E-9 : f32
    %10 = vector.broadcast %cst : f32 to vector<1x256xf32>
    %11 = arith.addf %9, %10 : vector<1x256xf32>
    %12 = math.rsqrt %11 : vector<1x256xf32>
    %13 = vector.broadcast %0 : vector<3x1xf32> to vector<3x256xf32>
    %14 = arith.mulf %2, %13 : vector<3x256xf32>
    %15 = vector.extract_strided_slice %14 {offsets = [0, 0], sizes = [1, 256], strides = [1, 1]} : vector<3x256xf32> to vector<1x256xf32>
    %16 = vector.extract_strided_slice %14 {offsets = [1, 0], sizes = [1, 256], strides = [1, 1]} : vector<3x256xf32> to vector<1x256xf32>
    %17 = arith.addf %15, %16 : vector<1x256xf32>
    %18 = vector.extract_strided_slice %14 {offsets = [2, 0], sizes = [1, 256], strides = [1, 1]} : vector<3x256xf32> to vector<1x256xf32>
    %19 = arith.addf %17, %18 : vector<1x256xf32>
    %20 = arith.mulf %19, %12 : vector<1x256xf32>
    %cst_7 = arith.constant 0.000000e+00 : f32
    %21 = vector.broadcast %cst_7 : f32 to vector<1x256xf32>
    %22 = arith.maximumf %20, %21 : vector<1x256xf32>
    %23 = math.tanh %1 : vector<3x256xf32>
    %cst_8 = arith.constant 5.000000e-01 : f32
    %24 = vector.broadcast %cst_8 : f32 to vector<3x256xf32>
    %25 = arith.mulf %24, %23 : vector<3x256xf32>
    %cst_9 = arith.constant 5.000000e-01 : f32
    %26 = vector.broadcast %cst_9 : f32 to vector<3x256xf32>
    %27 = arith.addf %26, %25 : vector<3x256xf32>
    %28 = vector.broadcast %0 : vector<3x1xf32> to vector<3x256xf32>
    %29 = arith.mulf %3, %28 : vector<3x256xf32>
    %30 = vector.extract_strided_slice %29 {offsets = [0, 0], sizes = [1, 256], strides = [1, 1]} : vector<3x256xf32> to vector<1x256xf32>
    %31 = vector.extract_strided_slice %29 {offsets = [1, 0], sizes = [1, 256], strides = [1, 1]} : vector<3x256xf32> to vector<1x256xf32>
    %32 = arith.addf %30, %31 : vector<1x256xf32>
    %33 = vector.extract_strided_slice %29 {offsets = [2, 0], sizes = [1, 256], strides = [1, 1]} : vector<3x256xf32> to vector<1x256xf32>
    %34 = arith.addf %32, %33 : vector<1x256xf32>
    %35 = math.absf %34 : vector<1x256xf32>
    %cst_10 = arith.constant 1.000000e-01 : f32
    %36 = vector.broadcast %cst_10 : f32 to vector<1x256xf32>
    %37 = arith.mulf %36, %35 : vector<1x256xf32>
    %38 = vector.broadcast %22 : vector<1x256xf32> to vector<3x256xf32>
    %39 = arith.mulf %27, %38 : vector<3x256xf32>
    %40 = vector.broadcast %37 : vector<1x256xf32> to vector<3x256xf32>
    %41 = arith.addf %39, %40 : vector<3x256xf32>
    %cst_11 = arith.constant 0.000000e+00 : f32
    %42 = vector.broadcast %cst_11 : f32 to vector<8x256xf32>
    %c0_12 = arith.constant 0 : index
    %c0_13 = arith.constant 0 : index
    %43 = vector.load %arg5[%c0_12, %c0_13] : memref<8x256xf32, #tpu.memory_space<vmem>>, vector<8x256xf32>
    tpu.vector_store %arg5[%c0_12, %c0_13], %42 {strides = array<i32>} : memref<8x256xf32, #tpu.memory_space<vmem>>, vector<8x256xf32>,
    %c0_14 = arith.constant 0 : index
    %c0_15 = arith.constant 0 : index
    %44 = vector.load %arg5[%c0_14, %c0_15] : memref<8x256xf32, #tpu.memory_space<vmem>>, vector<3x256xf32>
    tpu.vector_store %arg5[%c0_14, %c0_15], %41 {strides = array<i32>} : memref<8x256xf32, #tpu.memory_space<vmem>>, vector<3x256xf32>,
    return
  }
  func.func @transform_0(%arg0: i32) -> (i32, i32) {
    %c0_i32 = arith.constant 0 : i32
    %c0_i32_0 = arith.constant 0 : i32
    %c0_i32_1 = arith.constant 0 : i32
    return %c0_i32, %c0_i32_0 : i32, i32
  }
  func.func @transform_1(%arg0: i32) -> (i32, i32) {
    %c0_i32 = arith.constant 0 : i32
    %c0_i32_0 = arith.constant 0 : i32
    %c0_i32_1 = arith.constant 0 : i32
    return %c0_i32, %c0_i32_0 : i32, i32
  }
  func.func @transform_2(%arg0: i32) -> (i32, i32) {
    %c0_i32 = arith.constant 0 : i32
    %c0_i32_0 = arith.constant 0 : i32
    %c0_i32_1 = arith.constant 0 : i32
    return %c0_i32, %c0_i32_0 : i32, i32
  }
  func.func @transform_3(%arg0: i32) -> (i32, i32) {
    %c0_i32 = arith.constant 0 : i32
    %c0_i32_0 = arith.constant 0 : i32
    %c0_i32_1 = arith.constant 0 : i32
    return %c0_i32, %c0_i32_0 : i32, i32
  }
  func.func @transform_4(%arg0: i32) -> (i32, i32) {
    %c0_i32 = arith.constant 0 : i32
    %c0_i32_0 = arith.constant 0 : i32
    %c0_i32_1 = arith.constant 0 : i32
    return %c0_i32, %c0_i32_0 : i32, i32
  }
}

</mosaic_0001>

<bundles_post_ra>
// kernel: tpu_custom_call.1
= control target key start
LH: loop header
LB: loop body
LE: loop exit
PB: predicated region body
PF: predicated region fallthrough
CT: control target
= control target key end

     0   :  { %9 = vsyncpa [#allocation3], 0  ;;  %s282_s0 = inlined_call_operand.vmem [shape: f32[3,1], index: 0, kind: input, shape index: {}]   ;;  %s283_s1 = inlined_call_operand.vmem [shape: f32[3,256], index: 1, kind: input, shape index: {}]   ;;  %s284_s2 = inlined_call_operand.hbm [shape: f32[3,256], index: 2, kind: input, shape index: {}]   ;;  %s285_s3 = inlined_call_operand.vmem [shape: f32[3,256], index: 3, kind: input, shape index: {}]   ;;  %s286_s4 = inlined_call_operand.hbm [shape: f32[8,256], index: 4, kind: output, shape index: {}]  }
   0x1   :  { %10 = vsyncpa [#allocation4], 0  ;;  %s219_s15 = smov [#allocation2]   ;;  %s171_s19 = scalar_lea.hbm %s284_s2, 128 }
   0x2   :  { %s21_s16 = sshll.u32 %s219_s15, 4  ;;  %p172_p0 = scmp.ne.s32.totalorder %s284_s2, %s171_s19  ;;  %s22_s16 = int_to_ptr.vmem [resolvable:$true] %s21_s16 }
   0x3   :  { %p175_p1 = scmp.lt.u32.totalorder %s171_s19, %s284_s2 }
   0x5   :  { %p177_p2 = pnand %p175_p1, %p172_p0 }
   0x7   :  { %180 = shalt.err (!%p177_p2)
}
   0x8   :  { %s181_s24 = scalar_lea.vmem %s22_s16, 128  ;;  %p186_p4 = scmp.lt.s32.totalorder %s22_s16, %s22_s16 }
   0x9   :  { %p182_p3 = scmp.ne.s32.totalorder %s22_s16, %s181_s24  ;;  %p187_p5 = scmp.lt.s32.totalorder %s181_s24, %s181_s24 }
   0xb   :  { %p188_p6 = por %p187_p5, %p186_p4 }
   0xd   :  { %p189_p7 = pnand %p188_p6, %p182_p3 }
   0xf   :  { %192 = shalt.err (!%p189_p7)
}
  0x10   :  { %24 = dma.hbm_to_vmem [thread:$0]  %s284_s2, 128, %s22_s16, [#allocation3]  }
  0x11   :  { %215 = dma.done.wait [#allocation3], 128  }
  0x12   :  { %216 = vsyncadd [#allocation3], 4294967168  ;;  %v220_v0 = vmov 0   ;;  %v30_v1 = vld [vmem:[%s282_s0] sm:$0x7]  ;;  %v221_v2 = vmov 0.0   ;;  %v53_v10 = vlaneseq }
  0x13   :  { %166 = vset.pattern.permute.xlu0 %v220_v0  ;;  %133 = vst [vmem:[#allocation5] sm:$0xff] %v221_v2  ;;  %134 = vst [vmem:[#allocation5 + $0x8] sm:$0xff] %v221_v2  ;;  %v32_v3 = vld [vmem:[#allocation2] sm:$0x77]  ;;  %v222_v8 = vmov 839922192  }
  0x14   :  { %48 = vperm.xlu0 %166, %v30_v1   ;;  %v34_v4 = vmul.f32 %v32_v3, %v32_v3  ;;  %v51_v9 = vunpack.c.l.s4 %v222_v8  ;;  %v54_v13 = vshrl.u32 %v53_v10, 7  ;;  %v31_v15 = vld [vmem:[%s283_s1] sm:$0x77]  ;;  %s223_s1 = smov [#allocation5]  }
  0x15   :  { %v33_v17 = vld [vmem:[%s285_s3] sm:$0x77]  ;;  %s146_s3 = sshll.u32 %s223_s1, 4  ;;  %s147_s3 = int_to_ptr.vmem [resolvable:$true] %s146_s3 }
  0x16   :  { %v155_v5 = vrot.slane %v34_v4, 9  ;;  %v156_v7 = vrot.slane %v34_v4, 10  ;;  %v52_v12 = vunpack.c.0.s8 %v51_v9  ;;  %v88_v32 = vsub.s32 0, %v54_v13  ;;  %s193_s5 = scalar_lea.vmem %s147_s3, 256  ;;  %p198_p9 = scmp.lt.s32.totalorder %s147_s3, %s147_s3 }
  0x17   :  { %v92_v33 = vsub.s32 4, %v54_v13  ;;  %p194_p8 = scmp.ne.s32.totalorder %s147_s3, %s193_s5  ;;  %p199_p10 = scmp.lt.s32.totalorder %s193_s5, %s193_s5 }
  0x18   :  { %v39_v6 = vadd.f32 %v155_v5, %v34_v4  ;;  %v55_v16 = vsub.s32 %v52_v12, %v54_v13 }
  0x19   :  { %p200_p11 = por %p199_p10, %p198_p9 }
  0x1a   :  { %v43_v11 = vadd.f32 %v156_v7, %v39_v6 }
  0x1b   :  { %p201_p12 = pnand %p200_p11, %p194_p8 }
  0x1c   :  { %v44_v14 = vadd.f32 1e-08, %v43_v11 }
  0x1e   :  { %167 = vrsqrt.f32 %v44_v14 }
  0x1f   :  { %169 = vtanh.f32 %v31_v15 }
  0x28   :  { %v168_v28 = vpop.eup %167 }
  0x29   :  { %v170_v29 = vpop.eup %169 }
  0x2a   :  { %v71_v36 = vmul.f32 0.5, %v170_v29 }
  0x2c   :  { %v72_v43 = vadd.f32 0.5, %v71_v36 }
  0x93   :  { %v49_v18 = vpop.permute.xlu0 %48 }
  0x94   :  { %v56_v19 = vrot.slane %v49_v18, %v55_v16 }
  0x96   :  { %v58_v20 = vmul.f32 %v56_v19, %v32_v3  ;;  %v73_v21 = vmul.f32 %v56_v19, %v33_v17 }
  0x98   :  { %v157_v22 = vrot.slane %v58_v20, 9  ;;  %v159_v23 = vrot.slane %v73_v21, 9  ;;  %v158_v25 = vrot.slane %v58_v20, 10  ;;  %v160_v27 = vrot.slane %v73_v21, 10 }
  0x9a   :  { %v63_v24 = vadd.f32 %v157_v22, %v58_v20  ;;  %v78_v26 = vadd.f32 %v159_v23, %v73_v21 }
  0x9c   :  { %v67_v30 = vadd.f32 %v158_v25, %v63_v24  ;;  %v82_v31 = vadd.f32 %v160_v27, %v78_v26 }
  0x9e   :  { %v68_v34 = vmul.f32 %v168_v28, %v67_v30  ;;  %v83_v35 = vand.u32 2147483647, %v82_v31 }
  0xa0   :  { %v69_v37 = vmax.f32 %v68_v34, 0.0  ;;  %v84_v38 = vmul.f32 0.1, %v83_v35 }
  0xa2   :  { %v89_v39 = vrot.slane %v69_v37, %v88_v32  ;;  %v93_v40 = vrot.slane %v69_v37, %v92_v33  ;;  %v113_v41 = vrot.slane %v84_v38, %v88_v32  ;;  %v117_v42 = vrot.slane %v84_v38, %v92_v33 }
  0xa4   :  { %v99_v44 = vrot.slane %v89_v39, %v88_v32  ;;  %v103_v45 = vrot.slane %v93_v40, %v88_v32  ;;  %v123_v46 = vrot.slane %v113_v41, %v88_v32  ;;  %v127_v47 = vrot.slane %v117_v42, %v88_v32 }
  0xa6   :  { %v106_v48 = vcombine.low %v99_v44, %v103_v45  ;;  %v130_v50 = vcombine.low %v123_v46, %v127_v47 }
  0xa8   :  { %v108_v49 = vmul.f32 %v106_v48, %v72_v43 }
  0xaa   :  { %v132_v51 = vadd.f32 %v130_v50, %v108_v49 }
  0xac   :  { %v136_v52 = vcombine.high %v132_v51, %v132_v51  ;;  %138 = vst [vmem:[#allocation5] sm:$0x7] %v132_v51 }
  0xae   :  { %139 = vst [vmem:[#allocation5 + $0x8] sm:$0x7] %v136_v52 }
  0xaf   :  { %204 = shalt.err (!%p201_p12)
}
  0xb0   :  { %s205_s8 = scalar_lea.hbm %s286_s4, 256 }
  0xb1   :  { %p206_p13 = scmp.ne.s32.totalorder %s286_s4, %s205_s8  ;;  %p209_p0 = scmp.lt.u32.totalorder %s205_s8, %s286_s4 }
  0xb3   :  { %p211_p1 = pnand %p209_p0, %p206_p13 }
  0xb5   :  { %214 = shalt.err (!%p211_p1)
}
  0xb6   :  { %149 = dma.vmem_to_hbm [thread:$0]  %s147_s3, 256, %s286_s4, [#allocation4]  }
  0xb7   :  { %217 = dma.done.wait [#allocation4], 256  }
  0xb8   :  { %218 = vsyncadd [#allocation4], 4294967040 }
  0xb9   :  { %153 = vsyncpa [#allocation3], 1 }
  0xba   :  { %154 = vsyncpa [#allocation4], 1 }

</bundles_post_ra>
